<compile_context>
chip_gen: v7x
topology: tpu7x:2x2x1
jax: 0.10.0
libtpu: 0.0.40
codegen_flags: <defaults>
</compile_context>

<pallas_src>
import functools

import jax
import jax.numpy as jnp
from jax.experimental import pallas as pl
from jax.experimental.pallas import tpu as pltpu

LANE = 128


def _round_up(n, m):
    return ((n + m - 1) // m) * m


# ----------------------------- Pallas kernel ---------------------------------
def cemt_kernel(x_ref,                      # (B*S, Dt+Da)  f32
                w_in, b_in,                 # CCIM   (Dt+Da, HP) bf16 / (1, HP) f32
                w_qkv, b_qkv,               # EMSA   (HP, 3HP) bf16 / (1, 3HP) f32
                w_o, b_o,                   #        (HP, HP)  bf16 / (1, HP)  f32
                w_tm, b_tm,                 # CETM   (HP, HP)  bf16 / (1, HP)  f32
                w_c1, b_c1,                 # head   (HP, HP)  bf16 / (1, HP)  f32
                w_c2, b_c2,                 #        (HP, CP)  bf16 / (1, CP)  f32
                out_ref,                    # (B, CP) f32
                *, batch, seq, hidden):
    f32 = jnp.float32
    bf16 = jnp.bfloat16
    HP = w_in.shape[-1]

    x = x_ref[...].astype(bf16)                                     # (B*S, Din)

    # ---- CCIM: fused cross-modal projection + ReLU ---------------------------
    fused = jnp.maximum(
        jnp.dot(x, w_in[...], preferred_element_type=f32) + b_in[...], 0.0)   # (B*S, HP)

    # ---- EMSA: single fused QKV matmul, per-sample attention, residual -------
    qkv = jnp.dot(fused.astype(bf16), w_qkv[...],
                  preferred_element_type=f32) + b_qkv[...]                    # (B*S, 3HP)
    q = qkv[:, 0 * HP:1 * HP].reshape(batch, seq, HP)
    k = qkv[:, 1 * HP:2 * HP].reshape(batch, seq, HP)
    v = qkv[:, 2 * HP:3 * HP].reshape(batch, seq, HP)

    scale = hidden ** -0.5                   # real hidden dim, NOT the padded one
    scores = jnp.einsum('bsh,bth->bst', q.astype(bf16), k.astype(bf16),
                        preferred_element_type=f32) * scale                  # (B,S,S)
    scores = scores - jnp.max(scores, axis=-1, keepdims=True)
    e = jnp.exp(scores)
    attn = e * pl.reciprocal(jnp.sum(e, axis=-1, keepdims=True), approx=True)
    ctx = jnp.einsum('bst,bth->bsh', attn.astype(bf16), v.astype(bf16),
                     preferred_element_type=f32)                             # (B,S,HP)
    ctx = ctx.reshape(batch * seq, HP)
    attended = (fused
                + jnp.dot(ctx.astype(bf16), w_o[...], preferred_element_type=f32)
                + b_o[...])                                                  # (B*S, HP)

    # ---- CETM: tanh temporal projection + mean pool over sequence ------------
    tm = jnp.tanh(jnp.dot(attended.astype(bf16), w_tm[...],
                          preferred_element_type=f32) + b_tm[...])
    pooled = jnp.mean(tm.reshape(batch, seq, HP), axis=1)                    # (B, HP)

    # ---- classifier (Dropout(0.3) is identity in eval) ------------------------
    h1 = jnp.maximum(
        jnp.dot(pooled.astype(bf16), w_c1[...], preferred_element_type=f32)
        + b_c1[...], 0.0)
    logits = jnp.dot(h1.astype(bf16), w_c2[...],
                     preferred_element_type=f32) + b_c2[...]                 # (B, CP)

    out_ref[...] = logits


# ---------------------------- param packing -----------------------------------
def pack_params(params):
    """Fuse/pad the 18 raw Linear params into 12 lane-dense slabs.

    Weights are zero-padded to 128-lane multiples and cast to bf16; biases are
    zero-padded and kept f32 (added after the f32 accumulation). Zero padding
    keeps padded lanes exactly zero through relu/tanh/attention, so results in
    the real lanes match the unpadded computation bit-for-bit (up to bf16).
    """
    (wt, bt, wa, ba, wq, bq, wk, bk, wv, bv, wo, bo,
     wtm, btm, wc1, bc1, wc2, bc2) = params
    H = wq.shape[0]
    C = wc2.shape[1]
    HP = _round_up(H, LANE)
    CP = _round_up(C, LANE)

    def pad2(w, rows, cols):
        return jnp.zeros((rows, cols), w.dtype).at[:w.shape[0], :w.shape[1]].set(w)

    din = wt.shape[0] + wa.shape[0]
    w_in = pad2(jnp.concatenate([wt, wa], axis=0), din, HP)
    b_in = pad2(bt + ba, 1, HP)                                   # folded bias
    w_qkv = jnp.concatenate([pad2(wq, HP, HP), pad2(wk, HP, HP), pad2(wv, HP, HP)],
                            axis=1)                               # (HP, 3HP)
    b_qkv = jnp.concatenate([pad2(bq, 1, HP), pad2(bk, 1, HP), pad2(bv, 1, HP)],
                            axis=1)                               # (1, 3HP)
    w_o, b_o = pad2(wo, HP, HP), pad2(bo, 1, HP)
    w_tm, b_tm = pad2(wtm, HP, HP), pad2(btm, 1, HP)
    w_c1, b_c1 = pad2(wc1, HP, HP), pad2(bc1, 1, HP)
    w_c2, b_c2 = pad2(wc2, HP, CP), pad2(bc2, 1, CP)

    bf16 = jnp.bfloat16
    packed = [w_in.astype(bf16), b_in,
              w_qkv.astype(bf16), b_qkv,
              w_o.astype(bf16), b_o,
              w_tm.astype(bf16), b_tm,
              w_c1.astype(bf16), b_c1,
              w_c2.astype(bf16), b_c2]
    return packed, H, C, HP, CP


# ------------------------------- wrapper --------------------------------------
def cemt_net_pallas(text, audio, params):
    B, S, _ = text.shape
    packed, H, C, HP, CP = pack_params(params)

    # wrapper-side layout plumbing: concat modalities + flatten batch*seq
    x2d = jnp.concatenate([text, audio], axis=-1).reshape(B * S, -1)

    kernel = functools.partial(cemt_kernel, batch=B, seq=S, hidden=H)

    in_specs = [pl.BlockSpec(x2d.shape, lambda i: (0, 0))]
    for p in packed:                                   # all packed params are 2-D
        in_specs.append(pl.BlockSpec(p.shape, lambda i: (0, 0)))

    out = pl.pallas_call(
        kernel,
        out_shape=jax.ShapeDtypeStruct((B, CP), jnp.float32),
        grid_spec=pltpu.PrefetchScalarGridSpec(
            num_scalar_prefetch=0,
            grid=(1,),                                 # collapsed grid: one step
            in_specs=in_specs,
            out_specs=pl.BlockSpec((B, CP), lambda i: (0, 0)),
        ),
        compiler_params=pltpu.CompilerParams(
            dimension_semantics=("arbitrary",)),
    )(x2d, *packed)

    return out[:, :C]                                  # (B, C)


# ------------------------- pure-JAX reference ---------------------------------
def cemt_net_ref(text, audio, params):
    (wt, bt, wa, ba, wq, bq, wk, bk, wv, bv, wo, bo,
     wtm, btm, wc1, bc1, wc2, bc2) = params
    fused = jax.nn.relu(text @ wt + bt + audio @ wa + ba)
    q, k, v = fused @ wq + bq, fused @ wk + bk, fused @ wv + bv
    scores = jnp.einsum('bsh,bth->bst', q, k) / jnp.sqrt(jnp.float32(q.shape[-1]))
    attn = jax.nn.softmax(scores, axis=-1)
    attended = fused + jnp.einsum('bst,bth->bsh', attn, v) @ wo + bo
    pooled = jnp.mean(jnp.tanh(attended @ wtm + btm), axis=1)
    h1 = jax.nn.relu(pooled @ wc1 + bc1[0])
    return h1 @ wc2 + bc2[0]


# ---------------------------- param init --------------------------------------
def init_params(key, text_dim, audio_dim, hidden_dim, num_classes):
    def lin(k, din, dout):
        kw, kb = jax.random.split(k)
        scale = 1.0 / jnp.sqrt(jnp.float32(din))
        w = jax.random.uniform(kw, (din, dout), jnp.float32, -scale, scale)
        b = jax.random.uniform(kb, (1, dout), jnp.float32, -scale, scale)
        return w, b

    keys = jax.random.split(key, 9)
    wt, bt = lin(keys[0], text_dim, hidden_dim)
    wa, ba = lin(keys[1], audio_dim, hidden_dim)
    wq, bq = lin(keys[2], hidden_dim, hidden_dim)
    wk, bk = lin(keys[3], hidden_dim, hidden_dim)
    wv, bv = lin(keys[4], hidden_dim, hidden_dim)
    wo, bo = lin(keys[5], hidden_dim, hidden_dim)
    wtm, btm = lin(keys[6], hidden_dim, hidden_dim)
    wc1, bc1 = lin(keys[7], hidden_dim, hidden_dim)
    wc2, bc2 = lin(keys[8], hidden_dim, num_classes)
    return (wt, bt, wa, ba, wq, bq, wk, bk, wv, bv, wo, bo,
            wtm, btm, wc1, bc1, wc2, bc2)


# --------------------------------- main ----------------------------------------
if __name__ == "__main__":
    B, S = 2, 8
    TEXT_DIM, AUDIO_DIM, HIDDEN_DIM, NUM_CLASSES = 64, 64, 32, 2

    key = jax.random.PRNGKey(0)
    k_text, k_audio, k_params = jax.random.split(key, 3)
    text_feat = jax.random.normal(k_text, (B, S, TEXT_DIM), jnp.float32)
    audio_feat = jax.random.normal(k_audio, (B, S, AUDIO_DIM), jnp.float32)
    params = init_params(k_params, TEXT_DIM, AUDIO_DIM, HIDDEN_DIM, NUM_CLASSES)

    logits = cemt_net_pallas(text_feat, audio_feat, params)
    jax.block_until_ready(logits)

    ref = cemt_net_ref(text_feat, audio_feat, params)
    assert logits.shape == (B, NUM_CLASSES)
    # tolerance loosened vs. 1e-4 because matmul operands are bf16 (f32 accum)
    assert jnp.allclose(logits, ref, atol=3e-2, rtol=3e-2), (logits, ref)
    print("KERNEL_OK")
</pallas_src>

<mosaic_0001>
module attributes {stable_mosaic.version = 11 : i64} {
  func.func @cemt_kernel(%arg0: i32, %arg1: memref<16x128xf32, #tpu.memory_space<vmem>>, %arg2: memref<128x128xbf16, #tpu.memory_space<vmem>>, %arg3: memref<1x128xf32, #tpu.memory_space<vmem>>, %arg4: memref<128x384xbf16, #tpu.memory_space<vmem>>, %arg5: memref<1x384xf32, #tpu.memory_space<vmem>>, %arg6: memref<128x128xbf16, #tpu.memory_space<vmem>>, %arg7: memref<1x128xf32, #tpu.memory_space<vmem>>, %arg8: memref<128x128xbf16, #tpu.memory_space<vmem>>, %arg9: memref<1x128xf32, #tpu.memory_space<vmem>>, %arg10: memref<128x128xbf16, #tpu.memory_space<vmem>>, %arg11: memref<1x128xf32, #tpu.memory_space<vmem>>, %arg12: memref<128x128xbf16, #tpu.memory_space<vmem>>, %arg13: memref<1x128xf32, #tpu.memory_space<vmem>>, %arg14: memref<2x128xf32, #tpu.memory_space<vmem>>) attributes {dimension_semantics = [#tpu.dimension_semantics<arbitrary>], iteration_bounds = array<i64: 1>, scalar_prefetch = 0 : i64, scratch_operands = 0 : i64, tpu.core_type = #tpu.core_type<tc>, window_params = [{pipeline_mode = #tpu.pipeline_mode<synchronous>, transform_indices = @transform_0, window_bounds = array<i64: 16, 128>}, {pipeline_mode = #tpu.pipeline_mode<synchronous>, transform_indices = @transform_1, window_bounds = array<i64: 128, 128>}, {pipeline_mode = #tpu.pipeline_mode<synchronous>, transform_indices = @transform_2, window_bounds = array<i64: 1, 128>}, {pipeline_mode = #tpu.pipeline_mode<synchronous>, transform_indices = @transform_3, window_bounds = array<i64: 128, 384>}, {pipeline_mode = #tpu.pipeline_mode<synchronous>, transform_indices = @transform_4, window_bounds = array<i64: 1, 384>}, {pipeline_mode = #tpu.pipeline_mode<synchronous>, transform_indices = @transform_5, window_bounds = array<i64: 128, 128>}, {pipeline_mode = #tpu.pipeline_mode<synchronous>, transform_indices = @transform_6, window_bounds = array<i64: 1, 128>}, {pipeline_mode = #tpu.pipeline_mode<synchronous>, transform_indices = @transform_7, window_bounds = array<i64: 128, 128>}, {pipeline_mode = #tpu.pipeline_mode<synchronous>, transform_indices = @transform_8, window_bounds = array<i64: 1, 128>}, {pipeline_mode = #tpu.pipeline_mode<synchronous>, transform_indices = @transform_9, window_bounds = array<i64: 128, 128>}, {pipeline_mode = #tpu.pipeline_mode<synchronous>, transform_indices = @transform_10, window_bounds = array<i64: 1, 128>}, {pipeline_mode = #tpu.pipeline_mode<synchronous>, transform_indices = @transform_11, window_bounds = array<i64: 128, 128>}, {pipeline_mode = #tpu.pipeline_mode<synchronous>, transform_indices = @transform_12, window_bounds = array<i64: 1, 128>}, {pipeline_mode = #tpu.pipeline_mode<synchronous>, transform_indices = @transform_13, window_bounds = array<i64: 2, 128>}]} {
    %c0 = arith.constant 0 : index
    %c0_0 = arith.constant 0 : index
    %0 = vector.load %arg1[%c0, %c0_0] : memref<16x128xf32, #tpu.memory_space<vmem>>, vector<16x128xf32>
    %1 = arith.truncf %0 : vector<16x128xf32> to vector<16x128xbf16>
    %c0_1 = arith.constant 0 : index
    %c0_2 = arith.constant 0 : index
    %2 = vector.load %arg2[%c0_1, %c0_2] : memref<128x128xbf16, #tpu.memory_space<vmem>>, vector<128x128xbf16>
    %cst = arith.constant dense<0.000000e+00> : vector<16x128xf32>
    %3 = tpu.matmul %1, %2, %cst {dimension_numbers = #tpu.dot_dimension_numbers<[1], [0], [0], [1], [0, 0, 1, 1], [], []>} : vector<16x128xbf16>, vector<128x128xbf16>, vector<16x128xf32> -> vector<16x128xf32>
    %c0_3 = arith.constant 0 : index
    %c0_4 = arith.constant 0 : index
    %4 = vector.load %arg3[%c0_3, %c0_4] : memref<1x128xf32, #tpu.memory_space<vmem>>, vector<1x128xf32>
    %5 = vector.broadcast %4 : vector<1x128xf32> to vector<16x128xf32>
    %6 = arith.addf %3, %5 : vector<16x128xf32>
    %cst_5 = arith.constant 0.000000e+00 : f32
    %7 = vector.broadcast %cst_5 : f32 to vector<16x128xf32>
    %8 = arith.maximumf %6, %7 : vector<16x128xf32>
    %9 = arith.truncf %8 : vector<16x128xf32> to vector<16x128xbf16>
    %c0_6 = arith.constant 0 : index
    %c0_7 = arith.constant 0 : index
    %10 = vector.load %arg4[%c0_6, %c0_7] : memref<128x384xbf16, #tpu.memory_space<vmem>>, vector<128x384xbf16>
    %cst_8 = arith.constant dense<0.000000e+00> : vector<16x384xf32>
    %11 = tpu.matmul %9, %10, %cst_8 {dimension_numbers = #tpu.dot_dimension_numbers<[1], [0], [0], [1], [0, 0, 1, 1], [], []>} : vector<16x128xbf16>, vector<128x384xbf16>, vector<16x384xf32> -> vector<16x384xf32>
    %c0_9 = arith.constant 0 : index
    %c0_10 = arith.constant 0 : index
    %12 = vector.load %arg5[%c0_9, %c0_10] : memref<1x384xf32, #tpu.memory_space<vmem>>, vector<1x384xf32>
    %13 = vector.broadcast %12 : vector<1x384xf32> to vector<16x384xf32>
    %14 = arith.addf %11, %13 : vector<16x384xf32>
    %15 = vector.extract_strided_slice %14 {offsets = [0, 0], sizes = [16, 128], strides = [1, 1]} : vector<16x384xf32> to vector<16x128xf32>
    %16 = vector.shape_cast %15 : vector<16x128xf32> to vector<2x8x128xf32>
    %17 = vector.extract_strided_slice %14 {offsets = [0, 128], sizes = [16, 128], strides = [1, 1]} : vector<16x384xf32> to vector<16x128xf32>
    %18 = vector.shape_cast %17 : vector<16x128xf32> to vector<2x8x128xf32>
    %19 = vector.extract_strided_slice %14 {offsets = [0, 256], sizes = [16, 128], strides = [1, 1]} : vector<16x384xf32> to vector<16x128xf32>
    %20 = vector.shape_cast %19 : vector<16x128xf32> to vector<2x8x128xf32>
    %21 = arith.truncf %16 : vector<2x8x128xf32> to vector<2x8x128xbf16>
    %22 = arith.truncf %18 : vector<2x8x128xf32> to vector<2x8x128xbf16>
    "tpu.trace_start"() <{level = 10 : i32, message = "bsh,bth->bst"}> : () -> ()
    %cst_11 = arith.constant dense<0.000000e+00> : vector<2x8x8xf32>
    %23 = tpu.matmul %21, %22, %cst_11 {dimension_numbers = #tpu.dot_dimension_numbers<[2], [2], [1], [1], [0, 0, 0, 1, 1, 1], [0], [0]>} : vector<2x8x128xbf16>, vector<2x8x128xbf16>, vector<2x8x8xf32> -> vector<2x8x8xf32>
    "tpu.trace_stop"() : () -> ()
    %cst_12 = arith.constant 0.176776692 : f32
    %24 = vector.broadcast %cst_12 : f32 to vector<2x8x8xf32>
    %25 = arith.mulf %23, %24 : vector<2x8x8xf32>
    %cst_13 = arith.constant dense<0xFF800000> : vector<2x8xf32>
    %26 = vector.multi_reduction <maximumf>, %25, %cst_13 [2] : vector<2x8x8xf32> to vector<2x8xf32>
    %27 = vector.shape_cast %26 : vector<2x8xf32> to vector<2x8x1xf32>
    %28 = vector.broadcast %27 : vector<2x8x1xf32> to vector<2x8x8xf32>
    %29 = arith.subf %25, %28 : vector<2x8x8xf32>
    %30 = math.exp %29 : vector<2x8x8xf32>
    %cst_14 = arith.constant dense<0.000000e+00> : vector<2x8xf32>
    %31 = vector.multi_reduction <add>, %30, %cst_14 [2] : vector<2x8x8xf32> to vector<2x8xf32>
    %32 = vector.shape_cast %31 : vector<2x8xf32> to vector<2x8x1xf32>
    %33 = tpu.reciprocal %32 {approx = true} : vector<2x8x1xf32> -> vector<2x8x1xf32>
    %34 = vector.broadcast %33 : vector<2x8x1xf32> to vector<2x8x8xf32>
    %35 = arith.mulf %30, %34 : vector<2x8x8xf32>
    %36 = arith.truncf %35 : vector<2x8x8xf32> to vector<2x8x8xbf16>
    %37 = arith.truncf %20 : vector<2x8x128xf32> to vector<2x8x128xbf16>
    "tpu.trace_start"() <{level = 10 : i32, message = "bst,bth->bsh"}> : () -> ()
    %cst_15 = arith.constant dense<0.000000e+00> : vector<2x8x128xf32>
    %38 = tpu.matmul %36, %37, %cst_15 {dimension_numbers = #tpu.dot_dimension_numbers<[2], [1], [1], [2], [0, 0, 0, 1, 1, 2], [0], [0]>} : vector<2x8x8xbf16>, vector<2x8x128xbf16>, vector<2x8x128xf32> -> vector<2x8x128xf32>
    "tpu.trace_stop"() : () -> ()
    %39 = vector.shape_cast %38 : vector<2x8x128xf32> to vector<16x128xf32>
    %40 = arith.truncf %39 : vector<16x128xf32> to vector<16x128xbf16>
    %c0_16 = arith.constant 0 : index
    %c0_17 = arith.constant 0 : index
    %41 = vector.load %arg6[%c0_16, %c0_17] : memref<128x128xbf16, #tpu.memory_space<vmem>>, vector<128x128xbf16>
    %cst_18 = arith.constant dense<0.000000e+00> : vector<16x128xf32>
    %42 = tpu.matmul %40, %41, %cst_18 {dimension_numbers = #tpu.dot_dimension_numbers<[1], [0], [0], [1], [0, 0, 1, 1], [], []>} : vector<16x128xbf16>, vector<128x128xbf16>, vector<16x128xf32> -> vector<16x128xf32>
    %43 = arith.addf %8, %42 : vector<16x128xf32>
    %c0_19 = arith.constant 0 : index
    %c0_20 = arith.constant 0 : index
    %44 = vector.load %arg7[%c0_19, %c0_20] : memref<1x128xf32, #tpu.memory_space<vmem>>, vector<1x128xf32>
    %45 = vector.broadcast %44 : vector<1x128xf32> to vector<16x128xf32>
    %46 = arith.addf %43, %45 : vector<16x128xf32>
    %47 = arith.truncf %46 : vector<16x128xf32> to vector<16x128xbf16>
    %c0_21 = arith.constant 0 : index
    %c0_22 = arith.constant 0 : index
    %48 = vector.load %arg8[%c0_21, %c0_22] : memref<128x128xbf16, #tpu.memory_space<vmem>>, vector<128x128xbf16>
    %cst_23 = arith.constant dense<0.000000e+00> : vector<16x128xf32>
    %49 = tpu.matmul %47, %48, %cst_23 {dimension_numbers = #tpu.dot_dimension_numbers<[1], [0], [0], [1], [0, 0, 1, 1], [], []>} : vector<16x128xbf16>, vector<128x128xbf16>, vector<16x128xf32> -> vector<16x128xf32>
    %c0_24 = arith.constant 0 : index
    %c0_25 = arith.constant 0 : index
    %50 = vector.load %arg9[%c0_24, %c0_25] : memref<1x128xf32, #tpu.memory_space<vmem>>, vector<1x128xf32>
    %51 = vector.broadcast %50 : vector<1x128xf32> to vector<16x128xf32>
    %52 = arith.addf %49, %51 : vector<16x128xf32>
    %53 = math.tanh %52 : vector<16x128xf32>
    %54 = vector.shape_cast %53 : vector<16x128xf32> to vector<2x8x128xf32>
    %cst_26 = arith.constant dense<0.000000e+00> : vector<2x128xf32>
    %55 = vector.multi_reduction <add>, %54, %cst_26 [1] : vector<2x8x128xf32> to vector<2x128xf32>
    %cst_27 = arith.constant 8.000000e+00 : f32
    %56 = vector.broadcast %cst_27 : f32 to vector<2x128xf32>
    %57 = arith.divf %55, %56 : vector<2x128xf32>
    %58 = arith.truncf %57 : vector<2x128xf32> to vector<2x128xbf16>
    %c0_28 = arith.constant 0 : index
    %c0_29 = arith.constant 0 : index
    %59 = vector.load %arg10[%c0_28, %c0_29] : memref<128x128xbf16, #tpu.memory_space<vmem>>, vector<128x128xbf16>
    %cst_30 = arith.constant dense<0.000000e+00> : vector<2x128xf32>
    %60 = tpu.matmul %58, %59, %cst_30 {dimension_numbers = #tpu.dot_dimension_numbers<[1], [0], [0], [1], [0, 0, 1, 1], [], []>} : vector<2x128xbf16>, vector<128x128xbf16>, vector<2x128xf32> -> vector<2x128xf32>
    %c0_31 = arith.constant 0 : index
    %c0_32 = arith.constant 0 : index
    %61 = vector.load %arg11[%c0_31, %c0_32] : memref<1x128xf32, #tpu.memory_space<vmem>>, vector<1x128xf32>
    %62 = vector.broadcast %61 : vector<1x128xf32> to vector<2x128xf32>
    %63 = arith.addf %60, %62 : vector<2x128xf32>
    %cst_33 = arith.constant 0.000000e+00 : f32
    %64 = vector.broadcast %cst_33 : f32 to vector<2x128xf32>
    %65 = arith.maximumf %63, %64 : vector<2x128xf32>
    %66 = arith.truncf %65 : vector<2x128xf32> to vector<2x128xbf16>
    %c0_34 = arith.constant 0 : index
    %c0_35 = arith.constant 0 : index
    %67 = vector.load %arg12[%c0_34, %c0_35] : memref<128x128xbf16, #tpu.memory_space<vmem>>, vector<128x128xbf16>
    %cst_36 = arith.constant dense<0.000000e+00> : vector<2x128xf32>
    %68 = tpu.matmul %66, %67, %cst_36 {dimension_numbers = #tpu.dot_dimension_numbers<[1], [0], [0], [1], [0, 0, 1, 1], [], []>} : vector<2x128xbf16>, vector<128x128xbf16>, vector<2x128xf32> -> vector<2x128xf32>
    %c0_37 = arith.constant 0 : index
    %c0_38 = arith.constant 0 : index
    %69 = vector.load %arg13[%c0_37, %c0_38] : memref<1x128xf32, #tpu.memory_space<vmem>>, vector<1x128xf32>
    %70 = vector.broadcast %69 : vector<1x128xf32> to vector<2x128xf32>
    %71 = arith.addf %68, %70 : vector<2x128xf32>
    %c0_39 = arith.constant 0 : index
    %c0_40 = arith.constant 0 : index
    %72 = vector.load %arg14[%c0_39, %c0_40] : memref<2x128xf32, #tpu.memory_space<vmem>>, vector<2x128xf32>
    tpu.vector_store %arg14[%c0_39, %c0_40], %71 {strides = array<i32>} : memref<2x128xf32, #tpu.memory_space<vmem>>, vector<2x128xf32>,
    return
  }
  func.func @transform_0(%arg0: i32) -> (i32, i32) {
    %c0_i32 = arith.constant 0 : i32
    %c0_i32_0 = arith.constant 0 : i32
    %c0_i32_1 = arith.constant 0 : i32
    return %c0_i32, %c0_i32_0 : i32, i32
  }
  func.func @transform_1(%arg0: i32) -> (i32, i32) {
    %c0_i32 = arith.constant 0 : i32
    %c0_i32_0 = arith.constant 0 : i32
    %c0_i32_1 = arith.constant 0 : i32
    return %c0_i32, %c0_i32_0 : i32, i32
  }
  func.func @transform_2(%arg0: i32) -> (i32, i32) {
    %c0_i32 = arith.constant 0 : i32
    %c0_i32_0 = arith.constant 0 : i32
    %c0_i32_1 = arith.constant 0 : i32
    return %c0_i32, %c0_i32_0 : i32, i32
  }
  func.func @transform_3(%arg0: i32) -> (i32, i32) {
    %c0_i32 = arith.constant 0 : i32
    %c0_i32_0 = arith.constant 0 : i32
    %c0_i32_1 = arith.constant 0 : i32
    return %c0_i32, %c0_i32_0 : i32, i32
  }
  func.func @transform_4(%arg0: i32) -> (i32, i32) {
    %c0_i32 = arith.constant 0 : i32
    %c0_i32_0 = arith.constant 0 : i32
    %c0_i32_1 = arith.constant 0 : i32
    return %c0_i32, %c0_i32_0 : i32, i32
  }
  func.func @transform_5(%arg0: i32) -> (i32, i32) {
    %c0_i32 = arith.constant 0 : i32
    %c0_i32_0 = arith.constant 0 : i32
    %c0_i32_1 = arith.constant 0 : i32
    return %c0_i32, %c0_i32_0 : i32, i32
  }
  func.func @transform_6(%arg0: i32) -> (i32, i32) {
    %c0_i32 = arith.constant 0 : i32
    %c0_i32_0 = arith.constant 0 : i32
    %c0_i32_1 = arith.constant 0 : i32
    return %c0_i32, %c0_i32_0 : i32, i32
  }
  func.func @transform_7(%arg0: i32) -> (i32, i32) {
    %c0_i32 = arith.constant 0 : i32
    %c0_i32_0 = arith.constant 0 : i32
    %c0_i32_1 = arith.constant 0 : i32
    return %c0_i32, %c0_i32_0 : i32, i32
  }
  func.func @transform_8(%arg0: i32) -> (i32, i32) {
    %c0_i32 = arith.constant 0 : i32
    %c0_i32_0 = arith.constant 0 : i32
    %c0_i32_1 = arith.constant 0 : i32
    return %c0_i32, %c0_i32_0 : i32, i32
  }
  func.func @transform_9(%arg0: i32) -> (i32, i32) {
    %c0_i32 = arith.constant 0 : i32
    %c0_i32_0 = arith.constant 0 : i32
    %c0_i32_1 = arith.constant 0 : i32
    return %c0_i32, %c0_i32_0 : i32, i32
  }
  func.func @transform_10(%arg0: i32) -> (i32, i32) {
    %c0_i32 = arith.constant 0 : i32
    %c0_i32_0 = arith.constant 0 : i32
    %c0_i32_1 = arith.constant 0 : i32
    return %c0_i32, %c0_i32_0 : i32, i32
  }
  func.func @transform_11(%arg0: i32) -> (i32, i32) {
    %c0_i32 = arith.constant 0 : i32
    %c0_i32_0 = arith.constant 0 : i32
    %c0_i32_1 = arith.constant 0 : i32
    return %c0_i32, %c0_i32_0 : i32, i32
  }
  func.func @transform_12(%arg0: i32) -> (i32, i32) {
    %c0_i32 = arith.constant 0 : i32
    %c0_i32_0 = arith.constant 0 : i32
    %c0_i32_1 = arith.constant 0 : i32
    return %c0_i32, %c0_i32_0 : i32, i32
  }
  func.func @transform_13(%arg0: i32) -> (i32, i32) {
    %c0_i32 = arith.constant 0 : i32
    %c0_i32_0 = arith.constant 0 : i32
    %c0_i32_1 = arith.constant 0 : i32
    return %c0_i32, %c0_i32_0 : i32, i32
  }
}

</mosaic_0001>

<bundles_post_ra>
// kernel: tpu_custom_call.1
= control target key start
LH: loop header
LB: loop body
LE: loop exit
PB: predicated region body
PF: predicated region fallthrough
CT: control target
= control target key end

     0   :  { %18 = vsyncpa [#allocation3], 0  ;;  %s2103_s0 = inlined_call_operand.hbm [shape: f32[16,128], index: 0, kind: input, shape index: {}]   ;;  %s2104_s1 = inlined_call_operand.hbm [shape: bf16[128,128], index: 1, kind: input, shape index: {}]   ;;  %s2105_s2 = inlined_call_operand.vmem [shape: f32[1,128], index: 2, kind: input, shape index: {}]   ;;  %s2106_s3 = inlined_call_operand.hbm [shape: bf16[128,384], index: 3, kind: input, shape index: {}]   ;;  %s2107_s4 = inlined_call_operand.vmem [shape: f32[1,384], index: 4, kind: input, shape index: {}]   ;;  %s2108_s5 = inlined_call_operand.hbm [shape: bf16[128,128], index: 5, kind: input, shape index: {}]   ;;  %s2109_s6 = inlined_call_operand.vmem [shape: f32[1,128], index: 6, kind: input, shape index: {}]   ;;  %s2110_s7 = inlined_call_operand.hbm [shape: bf16[128,128], index: 7, kind: input, shape index: {}]   ;;  %s2111_s8 = inlined_call_operand.vmem [shape: f32[1,128], index: 8, kind: input, shape index: {}]   ;;  %s2112_s9 = inlined_call_operand.hbm [shape: bf16[128,128], index: 9, kind: input, shape index: {}]   ;;  %s2113_s10 = inlined_call_operand.vmem [shape: f32[1,128], index: 10, kind: input, shape index: {}]   ;;  %s2114_s11 = inlined_call_operand.hbm [shape: bf16[128,128], index: 11, kind: input, shape index: {}]   ;;  %s2115_s12 = inlined_call_operand.vmem [shape: f32[1,128], index: 12, kind: input, shape index: {}]   ;;  %s2116_s13 = inlined_call_operand.hbm [shape: f32[2,128], index: 13, kind: output, shape index: {}]  }
   0x1   :  { %19 = vsyncpa [#allocation6], 0 }
   0x2   :  { %20 = vsyncpa [#allocation9], 0 }
   0x3   :  { %21 = vsyncpa [#allocation12], 0 }
   0x4   :  { %22 = vsyncpa [#allocation4], 0  ;;  %s1790_s25 = smov [#allocation5]   ;;  %s1604_s29 = scalar_lea.hbm %s2104_s1, 1024 }
   0x5   :  { %s40_s26 = sshll.u32 %s1790_s25, 4  ;;  %p1605_p0 = scmp.ne.s32.totalorder %s2104_s1, %s1604_s29  ;;  %s41_s26 = int_to_ptr.vmem [resolvable:$true] %s40_s26 }
   0x6   :  { %p1608_p1 = scmp.lt.u32.totalorder %s1604_s29, %s2104_s1 }
   0x8   :  { %p1610_p2 = pnand %p1608_p1, %p1605_p0 }
   0xa   :  { %1613 = shalt.err (!%p1610_p2)
}
   0xb   :  { %s1614_s17 = scalar_lea.vmem %s41_s26, 1024  ;;  %p1619_p4 = scmp.lt.s32.totalorder %s41_s26, %s41_s26 }
   0xc   :  { %p1615_p3 = scmp.ne.s32.totalorder %s41_s26, %s1614_s17  ;;  %p1620_p5 = scmp.lt.s32.totalorder %s1614_s17, %s1614_s17 }
   0xe   :  { %p1621_p6 = por %p1620_p5, %p1619_p4 }
  0x10   :  { %p1622_p7 = pnand %p1621_p6, %p1615_p3 }
  0x12   :  { %1625 = shalt.err (!%p1622_p7)
}
  0x13   :  { %s1791_s18 = smov 64   ;;  %s1792_s19 = smov 4  }
  0x14   :  { %46 = dma.hbm_to_vmem [thread:$0]  %s2104_s1, 1024, %s41_s26, [#allocation6], %s1791_s18, %s1791_s18, %s1792_s19  }
  0x15   :  { %s1793_s22 = smov [#allocation8]   ;;  %s1794_s24 = smov [#allocation11]  }
  0x16   :  { %s68_s23 = sshll.u32 %s1793_s22, 4  ;;  %s96_s25 = sshll.u32 %s1794_s24, 4  ;;  %s69_s23 = int_to_ptr.vmem [resolvable:$true] %s68_s23  ;;  %s97_s25 = int_to_ptr.vmem [resolvable:$true] %s96_s25 }
  0x17   :  { %s1626_s29 = scalar_lea.hbm %s2108_s5, 1024 }
  0x18   :  { %p1627_p8 = scmp.ne.s32.totalorder %s2108_s5, %s1626_s29  ;;  %p1630_p9 = scmp.lt.u32.totalorder %s1626_s29, %s2108_s5 }
  0x1a   :  { %p1632_p10 = pnand %p1630_p9, %p1627_p8 }
  0x1c   :  { %1635 = shalt.err (!%p1632_p10)
}
  0x1d   :  { %s1636_s1 = scalar_lea.vmem %s69_s23, 1024  ;;  %p1641_p12 = scmp.lt.s32.totalorder %s69_s23, %s69_s23 }
  0x1e   :  { %p1637_p11 = scmp.ne.s32.totalorder %s69_s23, %s1636_s1  ;;  %p1642_p13 = scmp.lt.s32.totalorder %s1636_s1, %s1636_s1 }
  0x20   :  { %p1643_p0 = por %p1642_p13, %p1641_p12 }
  0x22   :  { %p1644_p1 = pnand %p1643_p0, %p1637_p11 }
  0x24   :  { %1647 = shalt.err (!%p1644_p1)
}
  0x25   :  { %74 = dma.hbm_to_vmem [thread:$0]  %s2108_s5, 1024, %s69_s23, [#allocation9], %s1791_s18, %s1791_s18, %s1792_s19  }
  0x26   :  { %s1648_s22 = scalar_lea.hbm %s2112_s9, 1024 }
  0x27   :  { %p1649_p2 = scmp.ne.s32.totalorder %s2112_s9, %s1648_s22  ;;  %p1652_p3 = scmp.lt.u32.totalorder %s1648_s22, %s2112_s9 }
  0x29   :  { %p1654_p4 = pnand %p1652_p3, %p1649_p2 }
  0x2b   :  { %1657 = shalt.err (!%p1654_p4)
}
  0x2c   :  { %s1658_s30 = scalar_lea.vmem %s97_s25, 1024  ;;  %p1663_p6 = scmp.lt.s32.totalorder %s97_s25, %s97_s25 }
  0x2d   :  { %p1659_p5 = scmp.ne.s32.totalorder %s97_s25, %s1658_s30  ;;  %p1664_p7 = scmp.lt.s32.totalorder %s1658_s30, %s1658_s30 }
  0x2f   :  { %p1665_p8 = por %p1664_p7, %p1663_p6 }
  0x31   :  { %p1666_p9 = pnand %p1665_p8, %p1659_p5 }
  0x33   :  { %1669 = shalt.err (!%p1666_p9)
}
  0x34   :  { %102 = dma.hbm_to_vmem [thread:$0]  %s2112_s9, 1024, %s97_s25, [#allocation12], %s1791_s18, %s1791_s18, %s1792_s19  }
  0x35   :  { %s1795_s14 = smov [#allocation2]   ;;  %s1670_s26 = scalar_lea.hbm %s2103_s0, 256 }
  0x36   :  { %s28_s15 = sshll.u32 %s1795_s14, 4  ;;  %p1671_p10 = scmp.ne.s32.totalorder %s2103_s0, %s1670_s26  ;;  %s29_s15 = int_to_ptr.vmem [resolvable:$true] %s28_s15 }
  0x37   :  { %p1674_p11 = scmp.lt.u32.totalorder %s1670_s26, %s2103_s0 }
  0x39   :  { %p1676_p12 = pnand %p1674_p11, %p1671_p10 }
  0x3b   :  { %1679 = shalt.err (!%p1676_p12)
}
  0x3c   :  { %s1680_s24 = scalar_lea.vmem %s29_s15, 256  ;;  %p1685_p0 = scmp.lt.s32.totalorder %s29_s15, %s29_s15 }
  0x3d   :  { %p1681_p13 = scmp.ne.s32.totalorder %s29_s15, %s1680_s24  ;;  %p1686_p1 = scmp.lt.s32.totalorder %s1680_s24, %s1680_s24 }
  0x3f   :  { %p1687_p2 = por %p1686_p1, %p1685_p0 }
  0x41   :  { %p1688_p3 = pnand %p1687_p2, %p1681_p13 }
  0x43   :  { %1691 = shalt.err (!%p1688_p3)
}
  0x44   :  { %s1796_s9 = smov 128   ;;  %s1797_s25 = smov 8  }
  0x45   :  { %34 = dma.hbm_to_vmem [thread:$0]  %s2103_s0, 256, %s29_s15, [#allocation3], %s1796_s9, %s1796_s9, %s1797_s25  }
  0x46   :  { %s1798_s29 = smov [#allocation7]   ;;  %s1692_s14 = scalar_lea.hbm %s2106_s3, 3072 }
  0x47   :  { %s54_s30 = sshll.u32 %s1798_s29, 4  ;;  %p1693_p4 = scmp.ne.s32.totalorder %s2106_s3, %s1692_s14  ;;  %s55_s30 = int_to_ptr.vmem [resolvable:$true] %s54_s30 }
  0x48   :  { %p1696_p5 = scmp.lt.u32.totalorder %s1692_s14, %s2106_s3 }
  0x4a   :  { %p1698_p6 = pnand %p1696_p5, %p1693_p4 }
  0x4c   :  { %1701 = shalt.err (!%p1698_p6)
}
  0x4d   :  { %s1702_s20 = scalar_lea.vmem %s55_s30, 3072  ;;  %p1707_p8 = scmp.lt.s32.totalorder %s55_s30, %s55_s30 }
  0x4e   :  { %p1703_p7 = scmp.ne.s32.totalorder %s55_s30, %s1702_s20  ;;  %p1708_p9 = scmp.lt.s32.totalorder %s1702_s20, %s1702_s20 }
  0x50   :  { %p1709_p10 = por %p1708_p9, %p1707_p8 }
  0x52   :  { %p1710_p11 = pnand %p1709_p10, %p1703_p7 }
  0x54   :  { %1713 = shalt.err (!%p1710_p11)
}
  0x55   :  { %s1799_s0 = smov 192   ;;  %s1800_s15 = smov 12  }
  0x56   :  { %60 = dma.hbm_to_vmem [thread:$0]  %s2106_s3, 3072, %s55_s30, [#allocation6], %s1799_s0, %s1799_s0, %s1800_s15  }
  0x57   :  { %s1801_s24 = smov [#allocation10]   ;;  %s1802_s25 = smov [#allocation13]  }
  0x58   :  { %s82_s9 = sshll.u32 %s1801_s24, 4  ;;  %s110_s27 = sshll.u32 %s1802_s25, 4  ;;  %s83_s9 = int_to_ptr.vmem [resolvable:$true] %s82_s9  ;;  %s111_s27 = int_to_ptr.vmem [resolvable:$true] %s110_s27 }
  0x59   :  { %s1714_s5 = scalar_lea.hbm %s2110_s7, 1024 }
  0x5a   :  { %p1715_p12 = scmp.ne.s32.totalorder %s2110_s7, %s1714_s5  ;;  %p1718_p13 = scmp.lt.u32.totalorder %s1714_s5, %s2110_s7 }
  0x5c   :  { %p1720_p0 = pnand %p1718_p13, %p1715_p12 }
  0x5e   :  { %1723 = shalt.err (!%p1720_p0)
}
  0x5f   :  { %s1724_s3 = scalar_lea.vmem %s83_s9, 1024  ;;  %p1729_p2 = scmp.lt.s32.totalorder %s83_s9, %s83_s9 }
  0x60   :  { %p1725_p1 = scmp.ne.s32.totalorder %s83_s9, %s1724_s3  ;;  %p1730_p3 = scmp.lt.s32.totalorder %s1724_s3, %s1724_s3 }
  0x62   :  { %p1731_p4 = por %p1730_p3, %p1729_p2 }
  0x64   :  { %p1732_p5 = pnand %p1731_p4, %p1725_p1 }
  0x66   :  { %1735 = shalt.err (!%p1732_p5)
}
  0x67   :  { %88 = dma.hbm_to_vmem [thread:$0]  %s2110_s7, 1024, %s83_s9, [#allocation9], %s1791_s18, %s1791_s18, %s1792_s19  }
  0x68   :  { %s1736_s0 = scalar_lea.hbm %s2114_s11, 1024 }
  0x69   :  { %p1737_p6 = scmp.ne.s32.totalorder %s2114_s11, %s1736_s0  ;;  %p1740_p7 = scmp.lt.u32.totalorder %s1736_s0, %s2114_s11 }
  0x6b   :  { %p1742_p8 = pnand %p1740_p7, %p1737_p6 }
  0x6d   :  { %1745 = shalt.err (!%p1742_p8)
}
  0x6e   :  { %s1746_s25 = scalar_lea.vmem %s111_s27, 1024  ;;  %p1751_p10 = scmp.lt.s32.totalorder %s111_s27, %s111_s27 }
  0x6f   :  { %p1747_p9 = scmp.ne.s32.totalorder %s111_s27, %s1746_s25  ;;  %p1752_p11 = scmp.lt.s32.totalorder %s1746_s25, %s1746_s25 }
  0x71   :  { %p1753_p12 = por %p1752_p11, %p1751_p10 }
  0x73   :  { %p1754_p13 = pnand %p1753_p12, %p1747_p9 }
  0x75   :  { %1757 = shalt.err (!%p1754_p13)
}
  0x76   :  { %116 = dma.hbm_to_vmem [thread:$0]  %s2114_s11, 1024, %s111_s27, [#allocation12], %s1791_s18, %s1791_s18, %s1792_s19  }
  0x77   :  { %1780 = dma.done.wait [#allocation3], 256  }
  0x78   :  { %1781 = vsyncadd [#allocation3], 4294967040 }
  0x79   :  { %1782 = dma.done.wait [#allocation6], 4096  }
  0x7a   :  { %1783 = vsyncadd [#allocation6], 4294963200 }
  0x7b   :  { %1784 = dma.done.wait [#allocation9], 2048  }
  0x7c   :  { %1785 = vsyncadd [#allocation9], 4294965248 }
  0x7d   :  { %1786 = dma.done.wait [#allocation12], 2048  }
  0x7e   :  { %1787 = vsyncadd [#allocation12], 4294965248  ;;  %v1803_v0 = vmov 0.0   ;;  %vm1804_vm0 = vmmov 0   ;;  %v1520_v1 = vld [vmem:[#allocation5] sm:$0xff]   ;;  %v1521_v2 = vld [vmem:[#allocation5 + $0x8] sm:$0xff]   ;;  %v293_v47 = vlaneseq }
  0x7f   :  { %1359 = vmatprep.subr.bf16.mxu0 %v1803_v0  ;;  %1375 = vmatprep.mubr.msk.bf16.mxu0 %vm1804_vm0, %v1803_v0  ;;  %v1522_v3 = vld [vmem:[#allocation5 + $0x10] sm:$0xff]   ;;  %v1530_v5 = vld [vmem:[#allocation7] ss:$12 sps:$4 sm:$0xff]   ;;  %v1523_v6 = vld [vmem:[#allocation5 + $0x18] sm:$0xff]   ;;  %v1805_v36 = vmov 0   ;;  %vm636_vm1 = vcmask 1043456  }
  0x80   :  { %1360 = vmatpush3.bf16.msra.mxu0 %v1520_v1  ;;  %v1528_v4 = vld [vmem:[#allocation7 + $0x4] ss:$12 sps:$4 sm:$0xff]   ;;  %v1532_v7 = vld [vmem:[#allocation7 + $0x1c] ss:$12 sps:$4 sm:$0xff]   ;;  %v1536_v10 = vld [vmem:[#allocation7 + $0x34] ss:$12 sps:$4 sm:$0xff]   ;;  %468 = vmatprep.mubr.bf16.mxu1 %v1805_v36 }
  0x81   :  { %1361 = vmatprep.subr.bf16.mxu0 %v1803_v0  ;;  %436 = vmatprep.subr.bf16.mxu1 %v1528_v4  ;;  %v1534_v8 = vld [vmem:[#allocation7 + $0x18] ss:$12 sps:$4 sm:$0xff]   ;;  %v1538_v11 = vld [vmem:[#allocation7 + $0x30] ss:$12 sps:$4 sm:$0xff]   ;;  %v1525_v13 = vld [vmem:[#allocation5 + $0x28] sm:$0xff]   ;;  %v294_v48 = vshrl.u32 %v293_v47, 7 }
  0x82   :  { %437 = vmatpush1.bf16.msra.mxu1 %v1530_v5  ;;  %v1524_v9 = vld [vmem:[#allocation5 + $0x20] sm:$0xff]   ;;  %v1540_v12 = vld [vmem:[#allocation7 + $0x4c] ss:$12 sps:$4 sm:$0xff]   ;;  %v1542_v14 = vld [vmem:[#allocation7 + $0x48] ss:$12 sps:$4 sm:$0xff]   ;;  %vm606_vm2 = vcmask 64512  }
  0x83   :  { %438 = vmatprep.subr.bf16.mxu1 %v1532_v7  ;;  %v1544_v15 = vld [vmem:[#allocation7 + $0x64] ss:$12 sps:$4 sm:$0xff]   ;;  %v1546_v17 = vld [vmem:[#allocation7 + $0x60] ss:$12 sps:$4 sm:$0xff]   ;;  %v1548_v18 = vld [vmem:[#allocation7 + $0x7c] ss:$12 sps:$4 sm:$0xff]  }
  0x84   :  { %1362 = vmatpush3.bf16.msra.mxu0 %v1521_v2  ;;  %v1526_v16 = vld [vmem:[#allocation5 + $0x30] sm:$0xff]   ;;  %v1527_v19 = vld [vmem:[#allocation5 + $0x38] sm:$0xff]   ;;  %v1535_v25 = vld [vmem:[#allocation7 + $0x20] ss:$12 sps:$4 sm:$0xff]   ;;  %v299_v49 = vsub.s32 1, %v294_v48  ;;  %v303_v51 = vsub.s32 2, %v294_v48 }
  0x85   :  { %1363 = vmatprep.subr.bf16.mxu0 %v1803_v0  ;;  %v141_v20 = vld [vmem:[#allocation2] sm:$0xff]  ;;  %v142_v21 = vld [vmem:[#allocation2 + $0x8] sm:$0xff]  ;;  %v1551_v29 = vld [vmem:[#allocation7 + $0x80] ss:$12 sps:$4 sm:$0xff]   ;;  %v295_v53 = vsub.s32 0, %v294_v48  ;;  %vm1002_vm3 = vcmask 1041409  }
  0x86   :  { %439 = vmatpush1.bf16.msra.mxu1 %v1534_v8  ;;  %v1550_v22 = vld [vmem:[#allocation7 + $0x78] ss:$12 sps:$4 sm:$0xff]   ;;  %v1531_v23 = vld [vmem:[#allocation7 + $0x8] ss:$12 sps:$4 sm:$0xff]   ;;  %v143_v24 = vpack.c.bf16 %v142_v21, %v141_v20  ;;  %v1543_v27 = vld [vmem:[#allocation7 + $0x50] ss:$12 sps:$4 sm:$0xff]  }
  0x87   :  { %440 = vmatprep.subr.bf16.mxu1 %v1536_v10  ;;  %v1539_v26 = vld [vmem:[#allocation7 + $0x38] ss:$12 sps:$4 sm:$0xff]   ;;  %v1547_v28 = vld [vmem:[#allocation7 + $0x68] ss:$12 sps:$4 sm:$0xff]   ;;  %v1554_v31 = vld [vmem:[#allocation7 + $0x90] ss:$12 sps:$4 sm:$0xff]  }
  0x88   :  { %1364 = vmatpush3.bf16.msra.mxu0 %v1522_v3  ;;  %v1552_v30 = vld [vmem:[#allocation7 + $0x94] ss:$12 sps:$4 sm:$0xff]   ;;  %v1555_v32 = vld [vmem:[#allocation7 + $0x98] ss:$12 sps:$4 sm:$0xff]   ;;  %v1559_v35 = vld [vmem:[#allocation7 + $0xb0] ss:$12 sps:$4 sm:$0xff]  }
  0x89   :  { %1365 = vmatprep.subr.bf16.mxu0 %v1803_v0  ;;  %v1556_v33 = vld [vmem:[#allocation7 + $0xac] ss:$12 sps:$4 sm:$0xff]   ;;  %v1558_v34 = vld [vmem:[#allocation7 + $0xa8] ss:$12 sps:$4 sm:$0xff]   ;;  %v1226_v37 = vld [vmem:[%s2105_s2] ss:$0 sm:$0xff] }
  0x8a   :  { %441 = vmatpush1.bf16.msra.mxu1 %v1538_v11  ;;  %v291_v50 = vld [vmem:[%s2107_s4] sm:$0x7]  ;;  %s1806_s14 = smov [#allocation14]  }
  0x8b   :  { %442 = vmatprep.subr.bf16.mxu1 %v1540_v12  ;;  %v300_v52 = vrot.slane %v291_v50, %v299_v49  ;;  %v304_v56 = vrot.slane %v291_v50, %v303_v51  ;;  %v296_v62 = vrot.slane %v291_v50, %v295_v53  ;;  %s1214_s16 = sshll.u32 %s1806_s14, 4  ;;  %s1215_s16 = int_to_ptr.vmem [resolvable:$true] %s1214_s16 }
  0x8c   :  { %1366 = vmatpush3.bf16.msra.mxu0 %v1523_v6  ;;  %p1763_p1 = scmp.lt.s32.totalorder %s1215_s16, %s1215_s16 }
  0x8d   :  { %1367 = vmatprep.subr.bf16.mxu0 %v1803_v0 }
  0x8e   :  { %443 = vmatpush1.bf16.msra.mxu1 %v1542_v14 }
  0x8f   :  { %444 = vmatprep.subr.bf16.mxu1 %v1544_v15 }
  0x90   :  { %1368 = vmatpush3.bf16.msra.mxu0 %v1524_v9 }
  0x91   :  { %1369 = vmatprep.subr.bf16.mxu0 %v1803_v0 }
  0x92   :  { %445 = vmatpush1.bf16.msra.mxu1 %v1546_v17 }
  0x93   :  { %446 = vmatprep.subr.bf16.mxu1 %v1548_v18 }
  0x94   :  { %1370 = vmatpush3.bf16.msra.mxu0 %v1525_v13 }
  0x95   :  { %1371 = vmatprep.subr.bf16.mxu0 %v1803_v0 }
  0x96   :  { %447 = vmatpush1.bf16.msra.mxu1 %v1550_v22 }
  0x97   :  { %448 = vmatprep.subr.bf16.mxu1 %v1552_v30 }
  0x98   :  { %1372 = vmatpush3.bf16.msra.mxu0 %v1526_v16 }
  0x99   :  { %1373 = vmatprep.subr.bf16.mxu0 %v1803_v0 }
  0x9a   :  { %449 = vmatpush1.bf16.msra.mxu1 %v1554_v31 }
  0x9b   :  { %450 = vmatprep.subr.bf16.mxu1 %v1556_v33 }
  0x9c   :  { %1374 = vmatpush3.bf16.msra.mxu0 %v1527_v19 }
  0x9d   :  { %1379 = vmatprep.subr.bf16.mxu0 %v1803_v0 }
  0x9e   :  { %451 = vmatpush1.bf16.msra.mxu1 %v1558_v34 }
  0x9f   :  { %1376 = vmatmul.mubr.bf16.vlgmr.msra.gmra.mrb[0].mxu0 %v143_v24  ;;  %1399 = vmatprep.subr.bf16.mxu1 %v1803_v0 }
  0xa0   :  { %1380 = vmatpush3.bf16.msra.mxu0 %v1531_v23  ;;  %1395 = vmatprep.mubr.msk.bf16.mxu0 %vm1804_vm0, %v1803_v0 }
  0xa1   :  { %1381 = vmatprep.subr.bf16.mxu0 %v1803_v0 }
  0xa4   :  { %1382 = vmatpush3.bf16.msra.mxu0 %v1535_v25 }
  0xa5   :  { %1383 = vmatprep.subr.bf16.mxu0 %v1803_v0 }
  0xa8   :  { %1384 = vmatpush3.bf16.msra.mxu0 %v1539_v26 }
  0xa9   :  { %1385 = vmatprep.subr.bf16.mxu0 %v1803_v0 }
  0xac   :  { %1386 = vmatpush3.bf16.msra.mxu0 %v1543_v27 }
  0xad   :  { %1387 = vmatprep.subr.bf16.mxu0 %v1803_v0 }
  0xb0   :  { %1388 = vmatpush3.bf16.msra.mxu0 %v1547_v28 }
  0xb1   :  { %1389 = vmatprep.subr.bf16.mxu0 %v1803_v0 }
  0xb4   :  { %1390 = vmatpush3.bf16.msra.mxu0 %v1551_v29 }
  0xb5   :  { %1391 = vmatprep.subr.bf16.mxu0 %v1803_v0 }
  0xb8   :  { %1392 = vmatpush3.bf16.msra.mxu0 %v1555_v32 }
  0xb9   :  { %1393 = vmatprep.subr.bf16.mxu0 %v1803_v0 }
  0xbc   :  { %1394 = vmatpush3.bf16.msra.mxu0 %v1559_v35 }
  0xbd   :  { %1423 = vmatprep.subr.bf16.mxu0 %v1803_v0 }
 0x172   :  { %v249_v38 = vpop.f32.mrb[0].mxu0 }
 0x173   :  { %v2001_v39 = vadd.f32 %v1226_v37, %v249_v38  ;;  %v1377_v40 = vpop.f32.mrb[1].mxu0  ;;  %v1561_v38 = vld [vmem:[#allocation8 + $0x8] sm:$0xff]  }
 0x174   :  { %v252_v41 = vpop.f32.mrb[2].mxu0  ;;  %v1562_v40 = vld [vmem:[#allocation8 + $0x10] sm:$0xff]  }
 0x175   :  { %v2003_v42 = vadd.f32 %v1226_v37, %v252_v41  ;;  %v1378_v43 = vpop.f32.mrb[3].mxu0  ;;  %v256_v44 = vmax.f32 %v2001_v39, 0.0  ;;  %v1560_v37 = vld [vmem:[#allocation8] sm:$0xff]   ;;  %v1563_v41 = vld [vmem:[#allocation8 + $0x18] sm:$0xff]   ;;  %v1577_v39 = vld [vmem:[#allocation11 + $0x8] sm:$0xff]  }
 0x176   :  { %v1564_v43 = vld [vmem:[#allocation8 + $0x20] sm:$0xff]  }
 0x177   :  { %v257_v45 = vmax.f32 %v2003_v42, 0.0  ;;  %v1579_v42 = vld [vmem:[#allocation11 + $0x18] sm:$0xff]  }
 0x179   :  { %v258_v46 = vpack.c.bf16 %v257_v45, %v256_v44 }
 0x17b   :  { %469 = vmatmul.mubr.bf16.vlgmr.msra.gmra.mrb[0].mxu1 %v258_v46  ;;  %1396 = vmatmul.mubr.bf16.vlgmr.msra.gmra.mrb[4].mxu0 %v258_v46 }
 0x17c   :  { %1401 = vmatprep.mubr.msk.bf16.mxu1 %vm1804_vm0, %v1803_v0  ;;  %1439 = vmatprep.mubr.msk.bf16.mxu0 %vm1804_vm0, %v1803_v0 }
 0x17d   :  { %1424 = vmatpush3.bf16.msra.mxu0 %v1560_v37 }
 0x17e   :  { %1425 = vmatprep.subr.bf16.mxu0 %v1803_v0 }
 0x181   :  { %1426 = vmatpush3.bf16.msra.mxu0 %v1561_v38 }
 0x182   :  { %1427 = vmatprep.subr.bf16.mxu0 %v1803_v0 }
 0x185   :  { %1428 = vmatpush3.bf16.msra.mxu0 %v1562_v40 }
 0x186   :  { %1429 = vmatprep.subr.bf16.mxu0 %v1803_v0 }
 0x189   :  { %1430 = vmatpush3.bf16.msra.mxu0 %v1563_v41 }
 0x18a   :  { %1431 = vmatprep.subr.bf16.mxu0 %v1803_v0 }
 0x18d   :  { %1432 = vmatpush3.bf16.msra.mxu0 %v1564_v43 }
 0x18e   :  { %1433 = vmatprep.subr.bf16.mxu0 %v1803_v0 }
 0x24e   :  { %v470_v54 = vpop.f32.mrb[0].mxu1  ;;  %v513_v55 = vpop.f32.mrb[4].mxu0 }
 0x24f   :  { %v472_v57 = vpop.f32.mrb[1].mxu1  ;;  %v1397_v58 = vpop.f32.mrb[5].mxu0  ;;  %v471_v5 = vadd.f32 %v470_v54, %v296_v62  ;;  %v514_v10 = vadd.f32 %v513_v55, %v304_v56  ;;  %v1565_v54 = vld [vmem:[#allocation8 + $0x28] sm:$0xff]   ;;  %v1566_v55 = vld [vmem:[#allocation8 + $0x30] sm:$0xff]  }
 0x250   :  { %v473_v59 = vadd.f32 %v472_v57, %v300_v52  ;;  %v474_v60 = vpop.f32.mrb[2].mxu1  ;;  %v516_v61 = vpop.f32.mrb[6].mxu0  ;;  %1434 = vmatpush3.bf16.msra.mxu0 %v1565_v54  ;;  %v1568_v57 = vld [vmem:[#allocation10] sm:$0xff]   ;;  %v1569_v58 = vld [vmem:[#allocation10 + $0x8] sm:$0xff]  }
 0x251   :  { %v517_v63 = vadd.f32 %v516_v61, %v304_v56  ;;  %v476_v1 = vpop.f32.mrb[3].mxu1  ;;  %v1398_v2 = vpop.f32.mrb[7].mxu0  ;;  %v520_v8 = vpack.c.bf16 %v471_v5, %v471_v5  ;;  %v475_v11 = vadd.f32 %v474_v60, %v296_v62  ;;  %v631_v12 = vpack.c.bf16 %v514_v10, %v514_v10  ;;  %1435 = vmatprep.subr.bf16.mxu0 %v1803_v0  ;;  %v1567_v56 = vld [vmem:[#allocation8 + $0x38] sm:$0xff]   ;;  %v1572_v61 = vld [vmem:[#allocation10 + $0x20] sm:$0xff]   ;;  %v1573_v62 = vld [vmem:[#allocation10 + $0x28] sm:$0xff]  }
 0x252   :  { %v522_v3 = vpack.c.bf16 %v473_v59, %v473_v59  ;;  %v477_v7 = vadd.f32 %v476_v1, %v300_v52  ;;  %v1570_v59 = vld [vmem:[#allocation10 + $0x10] sm:$0xff]   ;;  %v1571_v60 = vld [vmem:[#allocation10 + $0x18] sm:$0xff]  }
 0x253   :  { %v632_v4 = vpack.c.bf16 %v517_v63, %v517_v63  ;;  %v521_v13 = vpack.c.bf16 %v475_v11, %v475_v11  ;;  %v638_v14 = vsel %vm636_vm1, %v631_v12, 0  ;;  %v1575_v10 = vld [vmem:[#allocation10 + $0x38] sm:$0xff]  }
 0x254   :  { %1400 = vmatpush3.bf16.xpose.msra.mxu1 %v522_v3  ;;  %v523_v9 = vpack.c.bf16 %v477_v7, %v477_v7  ;;  %1436 = vmatpush3.bf16.msra.mxu0 %v1566_v55 }
 0x255   :  { %v2019_v6 = vsel %vm636_vm1, %v632_v4, 0  ;;  %1405 = vmatprep.subr.bf16.mxu1 %v1803_v0  ;;  %1437 = vmatprep.subr.bf16.mxu0 %v1803_v0 }
 0x258   :  { %1438 = vmatpush3.bf16.msra.mxu0 %v1567_v56 }
 0x259   :  { %1463 = vmatprep.subr.bf16.mxu0 %v1803_v0 }
 0x25b   :  { %1402 = vmatmul.mubr.bf16.vlgmr.msra.gmra.mrb[4].mxu1 %v520_v8 }
 0x25c   :  { %1406 = vmatpush3.bf16.xpose.msra.mxu1 %v523_v9  ;;  %1407 = vmatprep.mubr.msk.bf16.mxu1 %vm1804_vm0, %v1803_v0  ;;  %v1574_v9 = vld [vmem:[#allocation10 + $0x30] sm:$0xff]  }
 0x25d   :  { %1411 = vmatprep.subr.bf16.mxu1 %v1803_v0 }
 0x263   :  { %1408 = vmatmul.mubr.bf16.vlgmr.msra.gmra.mrb[8].mxu1 %v521_v13 }
 0x264   :  { %1412 = vmatpush3.bf16.msra.mxu1 %v638_v14  ;;  %1413 = vmatprep.mubr.msk.bf16.mxu1 %vm1804_vm0, %v1803_v0  ;;  %v1269_v14 = vld [vmem:[%s2109_s6] ss:$0 sm:$0xff] }
 0x265   :  { %1417 = vmatprep.subr.bf16.mxu1 %v1803_v0 }
 0x32e   :  { %v558_v15 = vpop.f32.mrb[4].mxu1 }
 0x32f   :  { %v604_v16 = vmul.f32 0.17677669, %v558_v15  ;;  %v1403_v17 = vpop.f32.mrb[5].mxu1 }
 0x330   :  { %v561_v18 = vpop.f32.mrb[6].mxu1 }
 0x331   :  { %v1404_v19 = vpop.f32.mrb[7].mxu1  ;;  %v607_v20 = vsel %vm606_vm2, %v604_v16, -inf }
 0x332   :  { %608 = vmax.xlane.f32.xlu0 %v607_v20 }
 0x336   :  { %v598_v21 = vpop.f32.mrb[8].mxu1 }
 0x337   :  { %v605_v22 = vmul.f32 0.17677669, %v598_v21  ;;  %v1409_v23 = vpop.f32.mrb[9].mxu1  ;;  %v1576_v21 = vld [vmem:[#allocation11] sm:$0xff]  }
 0x338   :  { %v601_v24 = vpop.f32.mrb[10].mxu1  ;;  %v1582_v23 = vld [vmem:[#allocation11 + $0x30] sm:$0xff]  }
 0x339   :  { %v1410_v25 = vpop.f32.mrb[11].mxu1  ;;  %v610_v26 = vsel %vm606_vm2, %v605_v22, -inf  ;;  %v1583_v24 = vld [vmem:[#allocation11 + $0x38] sm:$0xff]  }
 0x33a   :  { %611 = vmax.xlane.f32.xlu0 %v610_v26  ;;  %v1584_v25 = vld [vmem:[#allocation13] sm:$0xff]   ;;  %v1585_v26 = vld [vmem:[#allocation13 + $0x8] sm:$0xff]  }
 0x3bf   :  { %v609_v27 = vpop.xlane.xlu0 %608 }
 0x3c0   :  { %v613_v28 = vsub.f32 %v604_v16, %v609_v27  ;;  %v1586_v27 = vld [vmem:[#allocation13 + $0x10] sm:$0xff]  }
 0x3c2   :  { %v615_v29 = vmul.f32 1.442695, %v613_v28  ;;  %v1587_v28 = vld [vmem:[#allocation13 + $0x18] sm:$0xff]  }
 0x3c4   :  { %1592 = vpow2.f32 %v615_v29  ;;  %v1588_v29 = vld [vmem:[#allocation13 + $0x20] sm:$0xff]  }
 0x3c7   :  { %v612_v30 = vpop.xlane.xlu0 %611 }
 0x3c8   :  { %v614_v31 = vsub.f32 %v605_v22, %v612_v30  ;;  %v1581_v22 = vld [vmem:[#allocation11 + $0x28] sm:$0xff]  }
 0x3c9   :  { %v1589_v30 = vld [vmem:[#allocation13 + $0x28] sm:$0xff]  }
 0x3ca   :  { %v617_v32 = vmul.f32 1.442695, %v614_v31  ;;  %v1270_v31 = vld [vmem:[%s2111_s8] ss:$0 sm:$0xff] }
 0x3cc   :  { %1594 = vpow2.f32 %v617_v32 }
 0x3ce   :  { %v1593_v33 = vpop.eup %1592 }
 0x3cf   :  { %v619_v34 = vsel %vm606_vm2, %v1593_v33, 0.0 }
 0x3d0   :  { %620 = vadd.xlane.f32.xlu1 %v619_v34 }
 0x3d6   :  { %v1595_v35 = vpop.eup %1594 }
 0x3d7   :  { %v622_v36 = vsel %vm606_vm2, %v1595_v35, 0.0 }
 0x3d8   :  { %623 = vadd.xlane.f32.xlu1 %v622_v36 }
 0x45d   :  { %v621_v46 = vpop.xlane.xlu1 %620 }
 0x45e   :  { %1596 = vrcp.f32 %v621_v46 }
 0x465   :  { %v624_v47 = vpop.xlane.xlu1 %623 }
 0x466   :  { %1598 = vrcp.f32 %v624_v47 }
 0x468   :  { %v1597_v48 = vpop.eup %1596 }
 0x469   :  { %v627_v49 = vmul.f32 %v1597_v48, %v1593_v33 }
 0x46b   :  { %v629_v50 = vpack.c.bf16 %v627_v49, %v627_v49 }
 0x46d   :  { %1414 = vmatmul.mubr.msk.bf16.vlgmr.msra.gmra.mrb[12].mxu1 %vm606_vm2, %v629_v50 }
 0x46e   :  { %1418 = vmatpush3.bf16.msra.mxu1 %v2019_v6  ;;  %1419 = vmatprep.mubr.msk.bf16.mxu1 %vm1804_vm0, %v1803_v0 }
 0x46f   :  { %1443 = vmatprep.subr.bf16.mxu1 %v1803_v0 }
 0x470   :  { %v1599_v51 = vpop.eup %1598 }
 0x471   :  { %v628_v52 = vmul.f32 %v1599_v51, %v1595_v35 }
 0x473   :  { %v630_v53 = vpack.c.bf16 %v628_v52, %v628_v52 }
 0x475   :  { %1420 = vmatmul.mubr.msk.bf16.vlgmr.msra.gmra.mrb[16].mxu1 %vm606_vm2, %v630_v53 }
 0x476   :  { %1459 = vmatprep.mubr.msk.bf16.mxu1 %vm1804_vm0, %v1803_v0  ;;  %1444 = vmatpush3.bf16.msra.mxu1 %v1568_v57 }
 0x477   :  { %1445 = vmatprep.subr.bf16.mxu1 %v1803_v0 }
 0x47a   :  { %1446 = vmatpush3.bf16.msra.mxu1 %v1569_v58 }
 0x47b   :  { %1447 = vmatprep.subr.bf16.mxu1 %v1803_v0 }
 0x47e   :  { %1448 = vmatpush3.bf16.msra.mxu1 %v1570_v59 }
 0x47f   :  { %1449 = vmatprep.subr.bf16.mxu1 %v1803_v0 }
 0x482   :  { %1450 = vmatpush3.bf16.msra.mxu1 %v1571_v60 }
 0x483   :  { %1451 = vmatprep.subr.bf16.mxu1 %v1803_v0 }
 0x486   :  { %1452 = vmatpush3.bf16.msra.mxu1 %v1572_v61 }
 0x487   :  { %1453 = vmatprep.subr.bf16.mxu1 %v1803_v0 }
 0x48a   :  { %1454 = vmatpush3.bf16.msra.mxu1 %v1573_v62 }
 0x48b   :  { %1455 = vmatprep.subr.bf16.mxu1 %v1803_v0 }
 0x48e   :  { %1456 = vmatpush3.bf16.msra.mxu1 %v1574_v9 }
 0x48f   :  { %1457 = vmatprep.subr.bf16.mxu1 %v1803_v0 }
 0x492   :  { %1458 = vmatpush3.bf16.msra.mxu1 %v1575_v10 }
 0x493   :  { %1483 = vmatprep.subr.bf16.mxu1 %v1803_v0 }
 0x540   :  { %v674_v63 = vpop.f32.mrb[12].mxu1 }
 0x541   :  { %v1415_v1 = vpop.f32.mrb[13].mxu1 }
 0x542   :  { %v677_v2 = vpop.f32.mrb[14].mxu1  ;;  %v1590_v1 = vld [vmem:[#allocation13 + $0x30] sm:$0xff]  }
 0x543   :  { %v1416_v3 = vpop.f32.mrb[15].mxu1  ;;  %v1591_v2 = vld [vmem:[#allocation13 + $0x38] sm:$0xff]  }
 0x544   :  { %v1279_v3 = vld [vmem:[%s2113_s10] ss:$0 sm:$0xff]  ;;  %s1758_s10 = scalar_lea.vmem %s1215_s16, 32 }
 0x545   :  { %p1759_p0 = scmp.ne.s32.totalorder %s1215_s16, %s1758_s10  ;;  %p1764_p2 = scmp.lt.s32.totalorder %s1758_s10, %s1758_s10 }
 0x547   :  { %p1765_p3 = por %p1764_p2, %p1763_p1 }
 0x548   :  { %v720_v4 = vpop.f32.mrb[16].mxu1 }
 0x549   :  { %v726_v5 = vpack.c.bf16 %v720_v4, %v674_v63  ;;  %v1421_v6 = vpop.f32.mrb[17].mxu1  ;;  %p1766_p4 = pnand %p1765_p3, %p1759_p0 }
 0x54a   :  { %v723_v7 = vpop.f32.mrb[18].mxu1 }
 0x54b   :  { %v1422_v8 = vpop.f32.mrb[19].mxu1  ;;  %1440 = vmatmul.mubr.bf16.vlgmr.msra.gmra.mrb[8].mxu0 %v726_v5 }
 0x54c   :  { %1479 = vmatprep.mubr.msk.bf16.mxu0 %vm1804_vm0, %v1803_v0  ;;  %1464 = vmatpush3.bf16.msra.mxu0 %v1576_v21 }
 0x54d   :  { %1465 = vmatprep.subr.bf16.mxu0 %v1803_v0 }
 0x550   :  { %1466 = vmatpush3.bf16.msra.mxu0 %v1577_v39 }
 0x551   :  { %1467 = vmatprep.subr.bf16.mxu0 %v1803_v0 }
 0x61e   :  { %v825_v11 = vpop.f32.mrb[8].mxu0 }
 0x61f   :  { %v832_v12 = vadd.f32 %v825_v11, %v256_v44  ;;  %v1441_v13 = vpop.f32.mrb[9].mxu0  ;;  %v1578_v44 = vld [vmem:[#allocation11 + $0x10] sm:$0xff]  }
 0x620   :  { %v828_v15 = vpop.f32.mrb[10].mxu0  ;;  %1468 = vmatpush3.bf16.msra.mxu0 %v1578_v44  ;;  %v1288_v11 = vld [vmem:[%s2115_s12] ss:$0 sm:$0xff] }
 0x621   :  { %v833_v16 = vadd.f32 %v828_v15, %v257_v45  ;;  %v1442_v17 = vpop.f32.mrb[11].mxu0  ;;  %v841_v18 = vadd.f32 %v1269_v14, %v832_v12  ;;  %1469 = vmatprep.subr.bf16.mxu0 %v1803_v0  ;;  %v1580_v45 = vld [vmem:[#allocation11 + $0x20] sm:$0xff]  }
 0x623   :  { %v842_v19 = vadd.f32 %v1269_v14, %v833_v16 }
 0x624   :  { %1470 = vmatpush3.bf16.msra.mxu0 %v1579_v42 }
 0x625   :  { %v843_v20 = vpack.c.bf16 %v842_v19, %v841_v18  ;;  %1471 = vmatprep.subr.bf16.mxu0 %v1803_v0 }
 0x627   :  { %1460 = vmatmul.mubr.bf16.vlgmr.msra.gmra.mrb[20].mxu1 %v843_v20 }
 0x628   :  { %1499 = vmatprep.mubr.msk.bf16.mxu1 %vm1804_vm0, %v1803_v0  ;;  %1472 = vmatpush3.bf16.msra.mxu0 %v1580_v45 }
 0x629   :  { %1473 = vmatprep.subr.bf16.mxu0 %v1803_v0  ;;  %1484 = vmatpush3.bf16.msra.mxu1 %v1584_v25 }
 0x62a   :  { %1485 = vmatprep.subr.bf16.mxu1 %v1803_v0 }
 0x62c   :  { %1474 = vmatpush3.bf16.msra.mxu0 %v1581_v22 }
 0x62d   :  { %1475 = vmatprep.subr.bf16.mxu0 %v1803_v0  ;;  %1486 = vmatpush3.bf16.msra.mxu1 %v1585_v26 }
 0x62e   :  { %1487 = vmatprep.subr.bf16.mxu1 %v1803_v0 }
 0x630   :  { %1476 = vmatpush3.bf16.msra.mxu0 %v1582_v23 }
 0x631   :  { %1477 = vmatprep.subr.bf16.mxu0 %v1803_v0  ;;  %1488 = vmatpush3.bf16.msra.mxu1 %v1586_v27 }
 0x632   :  { %1489 = vmatprep.subr.bf16.mxu1 %v1803_v0 }
 0x634   :  { %1478 = vmatpush3.bf16.msra.mxu0 %v1583_v24 }
 0x635   :  { %1490 = vmatpush3.bf16.msra.mxu1 %v1587_v28 }
 0x636   :  { %1491 = vmatprep.subr.bf16.mxu1 %v1803_v0 }
 0x639   :  { %1492 = vmatpush3.bf16.msra.mxu1 %v1588_v29 }
 0x63a   :  { %1493 = vmatprep.subr.bf16.mxu1 %v1803_v0 }
 0x63d   :  { %1494 = vmatpush3.bf16.msra.mxu1 %v1589_v30 }
 0x63e   :  { %1495 = vmatprep.subr.bf16.mxu1 %v1803_v0 }
 0x641   :  { %1496 = vmatpush3.bf16.msra.mxu1 %v1590_v1 }
 0x642   :  { %1497 = vmatprep.subr.bf16.mxu1 %v1803_v0 }
 0x645   :  { %1498 = vmatpush3.bf16.msra.mxu1 %v1591_v2 }
 0x6fa   :  { %v949_v32 = vpop.f32.mrb[20].mxu1 }
 0x6fb   :  { %v950_v33 = vadd.f32 %v1270_v31, %v949_v32  ;;  %v1461_v34 = vpop.f32.mrb[21].mxu1 }
 0x6fc   :  { %v952_v35 = vpop.f32.mrb[22].mxu1 }
 0x6fd   :  { %1600 = vtanh.f32 %v950_v33  ;;  %v953_v36 = vadd.f32 %v1270_v31, %v952_v35  ;;  %v1462_v37 = vpop.f32.mrb[23].mxu1 }
 0x6ff   :  { %1602 = vtanh.f32 %v953_v36 }
 0x707   :  { %v1601_v38 = vpop.eup %1600 }
 0x708   :  { %v958_v40 = vrot.slane %v1601_v38, 4 }
 0x709   :  { %v1603_v41 = vpop.eup %1602 }
 0x70a   :  { %v959_v43 = vadd.f32 %v1601_v38, %v958_v40  ;;  %v964_v46 = vrot.slane %v1603_v41, 4 }
 0x70c   :  { %v960_v47 = vrot.slane %v959_v43, 2  ;;  %v965_v48 = vadd.f32 %v1603_v41, %v964_v46 }
 0x70e   :  { %v961_v49 = vadd.f32 %v960_v47, %v959_v43  ;;  %v966_v50 = vrot.slane %v965_v48, 2 }
 0x710   :  { %v967_v51 = vadd.f32 %v966_v50, %v965_v48  ;;  %v962_v52 = vrot.slane %v961_v49, 1 }
 0x712   :  { %v963_v53 = vadd.f32 %v962_v52, %v961_v49  ;;  %v968_v54 = vrot.slane %v967_v51, 1 }
 0x714   :  { %v969_v55 = vadd.f32 %v968_v54, %v967_v51  ;;  %v971_v56 = vmul.f32 0.125, %v963_v53 }
 0x716   :  { %v972_v57 = vmul.f32 0.125, %v969_v55  ;;  %v973_v58 = vpack.c.bf16 %v971_v56, %v971_v56 }
 0x718   :  { %v974_v59 = vpack.c.bf16 %v972_v57, %v972_v57  ;;  %v1000_v60 = vunpack.c.l.b16 %v973_v58 }
 0x71a   :  { %v1001_v61 = vunpack.c.l.b16 %v974_v59 }
 0x71c   :  { %v1003_v62 = vsel %vm1002_vm3, %v1001_v61, %v1000_v60 }
 0x71d   :  { %v1004_v63 = vpack.c.b16 %v1003_v62, %v1003_v62 }
 0x71f   :  { %1480 = vmatmul.mubr.bf16.vlgmr.msra.gmra.mrb[12].mxu0 %v1004_v63 }
 0x7f2   :  { %v1088_v4 = vpop.f32.mrb[12].mxu0 }
 0x7f3   :  { %v1089_v5 = vadd.f32 %v1279_v3, %v1088_v4  ;;  %v1481_v6 = vpop.f32.mrb[13].mxu0 }
 0x7f4   :  { %v1091_v7 = vpop.f32.mrb[14].mxu0 }
 0x7f5   :  { %v1094_v8 = vmax.f32 %v1089_v5, 0.0  ;;  %v1482_v9 = vpop.f32.mrb[15].mxu0 }
 0x7f7   :  { %v1095_v10 = vpack.c.bf16 %v1094_v8, %v1094_v8 }
 0x7f9   :  { %1500 = vmatmul.mubr.bf16.vlgmr.msra.gmra.mrb[24].mxu1 %v1095_v10 }
 0x8cc   :  { %v1201_v0 = vpop.f32.mrb[24].mxu1 }
 0x8cd   :  { %v1202_v12 = vadd.f32 %v1288_v11, %v1201_v0  ;;  %v1501_v13 = vpop.f32.mrb[25].mxu1 }
 0x8ce   :  { %v1204_v14 = vpop.f32.mrb[26].mxu1 }
 0x8cf   :  { %1207 = vst [vmem:[#allocation14] sm:$0x3] %v1202_v12  ;;  %v1502_v15 = vpop.f32.mrb[27].mxu1 }
 0x8d0   :  { %1769 = shalt.err (!%p1766_p4)
}
 0x8d1   :  { %s1770_s12 = scalar_lea.hbm %s2116_s13, 32 }
 0x8d2   :  { %p1771_p5 = scmp.ne.s32.totalorder %s2116_s13, %s1770_s12  ;;  %p1774_p6 = scmp.lt.u32.totalorder %s1770_s12, %s2116_s13 }
 0x8d4   :  { %p1776_p7 = pnand %p1774_p6, %p1771_p5 }
 0x8d6   :  { %1779 = shalt.err (!%p1776_p7)
}
 0x8d7   :  { %1217 = dma.vmem_to_hbm [thread:$0]  %s1215_s16, 32, %s2116_s13, [#allocation4]  }
 0x8d8   :  { %1788 = dma.done.wait [#allocation4], 32  }
 0x8d9   :  { %1789 = vsyncadd [#allocation4], 4294967264 }
 0x8da   :  { %1221 = vsyncpa [#allocation3], 1 }
 0x8db   :  { %1222 = vsyncpa [#allocation6], 1 }
 0x8dc   :  { %1223 = vsyncpa [#allocation9], 1 }
 0x8dd   :  { %1224 = vsyncpa [#allocation12], 1 }
 0x8de   :  { %1225 = vsyncpa [#allocation4], 1 }

</bundles_post_ra>
